<compile_context>
chip_gen: v6e
topology: v6e:2x2x1
jax: 0.10.0
libtpu: 0.0.40
codegen_flags: <defaults>
</compile_context>

<pallas_src>
import jax
import jax.numpy as jnp
from jax.experimental import pallas as pl
from jax.experimental.pallas import tpu as pltpu


_LANES = 128  # lane-dense output width (one vreg row)


def _global_variance_kernel(params_ref, out_ref):
    """params_ref: SMEM (5,) f32 = [q_mu, q_var, eps, prior_mean_sp, prior_var].
    out_ref:    VMEM (1, 128) f32; lane 0 <- x, lane 1 <- KL."""
    shape = (1, _LANES)

    # Splat the SMEM scalars into lane-dense vectors; all transcendentals then
    # run on the EUP / VPU vector path (no scalar-core transcendentals).
    mu = jnp.full(shape, params_ref[0], jnp.float32)
    qv = jnp.full(shape, params_ref[1], jnp.float32)
    eps = jnp.full(shape, params_ref[2], jnp.float32)
    pm = jnp.full(shape, params_ref[3], jnp.float32)
    pv = jnp.full(shape, params_ref[4], jnp.float32)

    # Reparameterized sample: sqrt(exp(q_var)) == exp(0.5 * q_var)  (no sqrt).
    e_half = jnp.exp(0.5 * qv)
    z = mu + e_half * eps
    # Numerically stable softplus (no broadcast-zero logaddexp).
    x = jnp.maximum(z, 0.0) + jnp.log1p(jnp.exp(-jnp.abs(z)))

    # KL(N(mu, var) || N(pm, pv));  var reused from e_half, and
    # log(var/pv) == q_var - log(pv)  (one fewer EUP exp, one fewer log).
    var = e_half * e_half
    inv_pv = pl.reciprocal(pv, approx=False)
    diff = mu - pm
    kl = 0.5 * (var * inv_pv + diff * diff * inv_pv - 1.0 - (qv - jnp.log(pv)))

    lane = jax.lax.broadcasted_iota(jnp.int32, shape, 1)
    out_ref[...] = jnp.where(lane == 0, x, kl)


def global_variance_forward(q_mu, q_var, eps, prior_mean_sp, prior_var):
    """All inputs are shape (1,) float32 arrays. Returns (x: (1,), KL: scalar)."""
    params = jnp.concatenate([
        q_mu.reshape(1), q_var.reshape(1), eps.reshape(1),
        prior_mean_sp.reshape(1), prior_var.reshape(1),
    ]).astype(jnp.float32)  # (5,)

    out = pl.pallas_call(
        _global_variance_kernel,
        out_shape=jax.ShapeDtypeStruct((1, _LANES), jnp.float32),
        in_specs=[pl.BlockSpec(memory_space=pltpu.MemorySpace.SMEM)],
        out_specs=pl.BlockSpec(memory_space=pltpu.MemorySpace.VMEM),
    )(params)

    x = out[0, 0].reshape(1)
    kl = out[0, 1]
    return x, kl


if __name__ == "__main__":
    key = jax.random.PRNGKey(0)
    k_qvar, k_eps = jax.random.split(key)

    # Deterministic "parameter" setup mirroring __init__:
    prior_mean = jnp.array([1.0], dtype=jnp.float32)            # prior mean (pre inverse-softplus)
    prior_variance = jnp.array([1.0], dtype=jnp.float32)
    prior_mu = jnp.log(jnp.exp(prior_mean) - 1.0)               # torch.log(torch.exp(prior_mean) - 1)
    q_mu = prior_mu                                             # nn.Parameter init value
    q_var = jax.random.normal(k_qvar, (1,), dtype=jnp.float32)  # torch.normal(0, 1, size=(1,))

    # sample_eps(): eps ~ N(0, 1)
    # TODO(synk): the PyTorch module samples eps inside forward(); here it is
    # sampled with jax.random outside the kernel and passed in.
    eps = jax.random.normal(k_eps, (1,), dtype=jnp.float32)

    x, kl = global_variance_forward(q_mu, q_var, eps, prior_mu, prior_variance)
    jax.block_until_ready((x, kl))

    # Pure-JAX reference check (same math outside the kernel).
    var_ref = jnp.exp(q_var)
    x_ref = jax.nn.softplus(q_mu + jnp.sqrt(var_ref) * eps)
    kl_ref = 0.5 * jnp.sum(var_ref / prior_variance
                           + (q_mu - prior_mu) ** 2 / prior_variance
                           - 1.0 - jnp.log(var_ref / prior_variance))
    assert jnp.allclose(x, x_ref, atol=1e-5, rtol=1e-5), (x, x_ref)
    assert jnp.allclose(kl, kl_ref, atol=1e-5, rtol=1e-5), (kl, kl_ref)

    print("KERNEL_OK")
</pallas_src>

<mosaic_0001>
module attributes {stable_mosaic.version = 11 : i64} {
  func.func @_global_variance_kernel(%arg0: memref<5xf32, #tpu.memory_space<smem>>, %arg1: memref<1x128xf32, #tpu.memory_space<vmem>>) attributes {dimension_semantics = [], scalar_prefetch = 0 : i64, scratch_operands = 0 : i64, tpu.core_type = #tpu.core_type<tc>} {
    %c0 = arith.constant 0 : index
    %0 = memref.load %arg0[%c0] : memref<5xf32, #tpu.memory_space<smem>>
    %1 = vector.broadcast %0 : f32 to vector<1x128xf32>
    %c1 = arith.constant 1 : index
    %2 = memref.load %arg0[%c1] : memref<5xf32, #tpu.memory_space<smem>>
    %3 = vector.broadcast %2 : f32 to vector<1x128xf32>
    %c2 = arith.constant 2 : index
    %4 = memref.load %arg0[%c2] : memref<5xf32, #tpu.memory_space<smem>>
    %5 = vector.broadcast %4 : f32 to vector<1x128xf32>
    %c3 = arith.constant 3 : index
    %6 = memref.load %arg0[%c3] : memref<5xf32, #tpu.memory_space<smem>>
    %7 = vector.broadcast %6 : f32 to vector<1x128xf32>
    %c4 = arith.constant 4 : index
    %8 = memref.load %arg0[%c4] : memref<5xf32, #tpu.memory_space<smem>>
    %9 = vector.broadcast %8 : f32 to vector<1x128xf32>
    %cst = arith.constant 5.000000e-01 : f32
    %10 = vector.broadcast %cst : f32 to vector<1x128xf32>
    %11 = arith.mulf %10, %3 : vector<1x128xf32>
    %12 = math.exp %11 : vector<1x128xf32>
    %13 = arith.mulf %12, %5 : vector<1x128xf32>
    %14 = arith.addf %1, %13 : vector<1x128xf32>
    %cst_0 = arith.constant 0.000000e+00 : f32
    %15 = vector.broadcast %cst_0 : f32 to vector<1x128xf32>
    %16 = arith.maximumf %14, %15 : vector<1x128xf32>
    %17 = math.absf %14 : vector<1x128xf32>
    %cst_1 = arith.constant 0.000000e+00 : f32
    %18 = vector.broadcast %cst_1 : f32 to vector<1x128xf32>
    %19 = arith.subf %18, %17 : vector<1x128xf32>
    %20 = math.exp %19 : vector<1x128xf32>
    %21 = math.log1p %20 : vector<1x128xf32>
    %22 = arith.addf %16, %21 : vector<1x128xf32>
    %23 = arith.mulf %12, %12 : vector<1x128xf32>
    %24 = tpu.reciprocal %9 : vector<1x128xf32> -> vector<1x128xf32>
    %25 = arith.subf %1, %7 : vector<1x128xf32>
    %26 = arith.mulf %23, %24 : vector<1x128xf32>
    %27 = arith.mulf %25, %25 : vector<1x128xf32>
    %28 = arith.mulf %27, %24 : vector<1x128xf32>
    %29 = arith.addf %26, %28 : vector<1x128xf32>
    %cst_2 = arith.constant 1.000000e+00 : f32
    %30 = vector.broadcast %cst_2 : f32 to vector<1x128xf32>
    %31 = arith.subf %29, %30 : vector<1x128xf32>
    %32 = math.log %9 : vector<1x128xf32>
    %33 = arith.subf %3, %32 : vector<1x128xf32>
    %34 = arith.subf %31, %33 : vector<1x128xf32>
    %cst_3 = arith.constant 5.000000e-01 : f32
    %35 = vector.broadcast %cst_3 : f32 to vector<1x128xf32>
    %36 = arith.mulf %35, %34 : vector<1x128xf32>
    %37 = tpu.iota {dimensions = array<i32: 1>} : vector<1x128xi32>
    %c0_i32 = arith.constant 0 : i32
    %38 = vector.broadcast %c0_i32 : i32 to vector<1x128xi32>
    %39 = arith.cmpi eq, %37, %38 : vector<1x128xi32>
    %40 = arith.select %39, %22, %36 : vector<1x128xi1>, vector<1x128xf32>
    %c0_4 = arith.constant 0 : index
    %c0_5 = arith.constant 0 : index
    %41 = vector.load %arg1[%c0_4, %c0_5] : memref<1x128xf32, #tpu.memory_space<vmem>>, vector<1x128xf32>
    tpu.vector_store %arg1[%c0_4, %c0_5], %40 {strides = array<i32>} : memref<1x128xf32, #tpu.memory_space<vmem>>, vector<1x128xf32>,
    return
  }
}

</mosaic_0001>

<bundles_post_ra>
// kernel: tpu_custom_call.1
= control target key start
LH: loop header
LB: loop body
LE: loop exit
PB: predicated region body
PF: predicated region fallthrough
CT: control target
= control target key end

     0   :  { %6 = vsyncpa [#allocation4], 0  ;;  %s153_s0 = inlined_call_operand.hbm [shape: f32[5], index: 0, kind: input, shape index: {}]   ;;  %s154_s1 = inlined_call_operand.hbm [shape: f32[1,128], index: 1, kind: output, shape index: {}]  }
   0x1   :  { %7 = vsyncpa [#allocation3], 0  ;;  %s132_s6 = smov [#allocation2]  }
   0x2   :  { %15 = dma.hbm_to_smem %s153_s0, 16, %s132_s6, [#allocation4]  }
   0x3   :  { %128 = dma.done.wait [#allocation4], 16  }
   0x4   :  { %129 = vsyncadd [#allocation4], 4294967280 }
   0x5   :  { %19 = sfence }
   0x6   :  { %s147_s9 = sld [smem:[#allocation2 + $0x1]]  ;;  %v63_v28 = vlaneseq  ;;  %s133_s13 = smov [#allocation5]  }
   0x7   :  { %s84_s10 = sld [smem:[#allocation2 + $0x2]]  ;;  %s74_s14 = sshll.u32 %s133_s13, 4  ;;  %s75_s14 = int_to_ptr.vmem [resolvable:$true] %s74_s14 }
   0x8   :  { %s20_s11 = sld [smem:[#allocation2]]  ;;  %v64_v32 = vand.u32 127, %v63_v28  ;;  %s108_s15 = scalar_lea.vmem %s75_s14, 16 }
   0x9   :  { %s86_s12 = sld [smem:[#allocation2 + $0x4]]  ;;  %p109_p0 = scmp.ne.s32.totalorder %s75_s14, %s108_s15 }
   0xa   :  { %s85_s0 = sld [smem:[#allocation2 + $0x3]]  ;;  %vm65_vm1 = vcmp.eq.s32.totalorder %v64_v32, 0  ;;  %s112_s16 = scalar_lea.vmem %s75_s14, 32 }
   0xb   :  { %p113_p1 = scmp.lt.s32.totalorder %s75_s14, %s75_s14  ;;  %p114_p2 = scmp.lt.s32.totalorder %s112_s16, %s108_s15 }
   0xc   :  { %v23_v0 = vstv %s147_s9 }
   0xd   :  { %v30_v1 = vmul.f32 0.5, %v23_v0  ;;  %v25_v3 = vstv %s84_s10  ;;  %p115_p3 = por %p114_p2, %p113_p1 }
   0xe   :  { %v21_v5 = vstv %s20_s11 }
   0xf   :  { %v31_v2 = vmul.f32 1.442695, %v30_v1  ;;  %v29_v9 = vstv %s86_s12  ;;  %p116_p4 = pnand %p115_p3, %p109_p0 }
  0x10   :  { %v27_v12 = vstv %s85_s0 }
  0x11   :  { %90 = vpow2.f32 %v31_v2  ;;  %v52_v13 = vsub.f32 %v21_v5, %v27_v12 }
  0x12   :  { %92 = vrcp.f32 %v29_v9 }
  0x13   :  { %v54_v15 = vmul.f32 %v52_v13, %v52_v13 }
  0x1e   :  { %v91_v4 = vpop.eup %90 }
  0x1f   :  { %v33_v6 = vmul.f32 %v91_v4, %v25_v3  ;;  %v50_v14 = vmul.f32 %v91_v4, %v91_v4  ;;  %v93_v16 = vpop.eup %92 }
  0x20   :  { %v55_v20 = vmul.f32 %v93_v16, %v54_v15 }
  0x21   :  { %v34_v7 = vadd.f32 %v33_v6, %v21_v5  ;;  %v53_v19 = vmul.f32 %v93_v16, %v50_v14 }
  0x23   :  { %v36_v8 = vand.u32 2147483647, %v34_v7  ;;  %v56_v22 = vadd.f32 %v55_v20, %v53_v19  ;;  %v35_v34 = vmax.f32 %v34_v7, 0.0 }
  0x25   :  { %v37_v10 = vsub.f32 0.0, %v36_v8  ;;  %v87_v25 = vadd.f32 -1.0, %v56_v22 }
  0x27   :  { %v38_v11 = vmul.f32 1.442695, %v37_v10 }
  0x29   :  { %94 = vpow2.f32 %v38_v11 }
  0x2a   :  { %96 = vlog2.f32 %v29_v9 }
  0x36   :  { %v95_v17 = vpop.eup %94 }
  0x37   :  { %v40_v18 = vadd.f32 1.0, %v95_v17  ;;  %v97_v21 = vpop.eup %96  ;;  %v43_v24 = vmul.f32 -0.5, %v95_v17  ;;  %v46_v29 = vand.u32 2147483647, %v95_v17 }
  0x38   :  { %v59_v23 = vmul.f32 0.6931472, %v97_v21 }
  0x39   :  { %98 = vlog2.f32 %v40_v18  ;;  %v44_v27 = vadd.f32 1.0, %v43_v24  ;;  %vm47_vm0 = vcmp.lt.f32.partialorder %v46_v29, 0.0004427343 }
  0x3a   :  { %v60_v26 = vsub.f32 %v23_v0, %v59_v23 }
  0x3b   :  { %v45_v31 = vmul.f32 %v95_v17, %v44_v27 }
  0x3c   :  { %v61_v30 = vsub.f32 %v87_v25, %v60_v26 }
  0x3e   :  { %v62_v36 = vmul.f32 0.5, %v61_v30 }
  0x46   :  { %v99_v33 = vpop.eup %98 }
  0x47   :  { %v42_v35 = vmul.f32 0.6931472, %v99_v33 }
  0x49   :  { %v48_v37 = vsel %vm47_vm0, %v45_v31, %v42_v35 }
  0x4a   :  { %v49_v38 = vadd.f32 %v48_v37, %v35_v34 }
  0x4c   :  { %v66_v39 = vsel %vm65_vm1, %v49_v38, %v62_v36 }
  0x4d   :  { %67 = vst [vmem:[#allocation5] sm:$0x1] %v66_v39 }
  0x4e   :  { %119 = shalt.err (!%p116_p4)
}
  0x4f   :  { %77 = dma.vmem_to_hbm [thread:$0]  %s75_s14, 16, %s154_s1, [#allocation3]  }
  0x50   :  { %130 = dma.done.wait [#allocation3], 16  }
  0x51   :  { %131 = vsyncadd [#allocation3], 4294967280 }
  0x52   :  { %81 = vsyncpa [#allocation3], 1 }
  0x53   :  { %82 = vsyncpa [#allocation4], 1 }

</bundles_post_ra>
